<compile_context>
chip_gen: v7x
topology: tpu7x:2x2x1
jax: 0.10.0
libtpu: 0.0.40
codegen_flags: <defaults>
</compile_context>

<pallas_src>
import jax
import jax.numpy as jnp
from jax.experimental import pallas as pl
from jax.experimental.pallas import tpu as pltpu


def _components_copy_kernel(c_ref, o_ref, copy_sem):
    # Single whole-array HBM -> HBM DMA: one descriptor, no VMEM residency,
    # no grid-step overhead. Runs at HBM roofline on v5e / v6e / v7x.
    copy = pltpu.make_async_copy(c_ref, o_ref, copy_sem)
    copy.start()
    copy.wait()


def components_copy_pallas(components: jax.Array) -> jax.Array:
    """Explicitly materialize a copy of the components via one HBM->HBM DMA."""
    n, d = components.shape
    itemsize = jnp.dtype(components.dtype).itemsize
    return pl.pallas_call(
        _components_copy_kernel,
        out_shape=jax.ShapeDtypeStruct((n, d), components.dtype),
        in_specs=[pl.BlockSpec(memory_space=pl.ANY)],
        out_specs=pl.BlockSpec(memory_space=pl.ANY),
        scratch_shapes=[pltpu.SemaphoreType.DMA(())],
        cost_estimate=pl.CostEstimate(
            flops=0,
            transcendentals=0,
            bytes_accessed=2 * n * d * itemsize,  # pure read + write memory op
        ),
    )(components)


# Below this size an explicit copy is cheaper through plain XLA than a kernel
# launch (fixed launch / DMA-issue overhead dominates for kilobyte arrays).
_SMALL_COPY_BYTES = 1 << 20  # 1 MiB


def components_forward(components: jax.Array,
                       *,
                       materialize: bool = False,
                       force_pallas: bool = False) -> jax.Array:
    """Components.forward(): return the components parameter.

    Default path is a zero-cost read-out (no HBM traffic, no kernel), which is
    exactly the semantics of the PyTorch module (it returns the Parameter
    itself). Set materialize=True to get a freshly materialized copy: tiny
    arrays use a plain XLA copy, large arrays go through the single-DMA
    Pallas kernel. force_pallas=True always uses the kernel.
    """
    if not materialize:
        return components
    n, d = components.shape
    nbytes = n * d * jnp.dtype(components.dtype).itemsize
    if nbytes < _SMALL_COPY_BYTES and not force_pallas:
        return jnp.array(components, copy=True)
    return components_copy_pallas(components)


class Components:
    """JAX mirror of prototorch Components: a set of adaptable tensors.

    The initializer is replaced by deterministic in-script generation
    (synthetic weights; no checkpoint loading).
    """
    # TODO(synk): torch Parameter registration / autograd `.detach().cpu()`
    # semantics have no Pallas equivalent; plain JAX arrays are used instead.

    def __init__(self, num_components: int, feature_dim: int, key):
        # `initializer.generate(num_components)` -> (num_components, feature_dim)
        self._components = jax.random.normal(
            key, (num_components, feature_dim), dtype=jnp.float32)

    def add_components(self, num_components: int, key):
        new = jax.random.normal(
            key, (num_components, self._components.shape[1]), dtype=jnp.float32)
        self._components = jnp.concatenate([self._components, new], axis=0)
        return new

    def remove_components(self, indices):
        n = self._components.shape[0]
        mask = jnp.ones((n,), dtype=bool).at[jnp.asarray(indices)].set(False)
        self._components = self._components[mask]
        return mask

    @property
    def num_components(self):
        return self._components.shape[0]

    @property
    def components(self):
        # Detached read-out (mirror of the PyTorch `.components` property).
        return self._components

    def __len__(self):
        return self.num_components

    def forward(self, *, materialize: bool = False, force_pallas: bool = False):
        """Return the components parameter tensor."""
        return components_forward(self._components,
                                  materialize=materialize,
                                  force_pallas=force_pallas)


if __name__ == "__main__":
    key = jax.random.PRNGKey(0)

    # Small, TPU-tile-aligned case.
    num_components, feature_dim = 8, 128
    module = Components(num_components, feature_dim, key)

    # Default forward: zero-copy identity read-out (matches torch semantics).
    out = jax.block_until_ready(module.forward())
    assert out.shape == (num_components, feature_dim)
    assert out.dtype == jnp.float32
    assert bool(jnp.array_equal(out, module._components))

    # Exercise the Pallas HBM->HBM DMA kernel once (forced materialized copy).
    out_copy = jax.block_until_ready(module.forward(materialize=True,
                                                    force_pallas=True))
    assert out_copy.shape == (num_components, feature_dim)
    assert bool(jnp.array_equal(out_copy, module._components))

    # Non-aligned row count (37 -> 42 -> 40 rows) + add/remove paths; the DMA
    # kernel has no (8,128) tiling constraints since it never touches VMEM.
    key2 = jax.random.PRNGKey(1)
    module2 = Components(37, 128, key2)
    module2.add_components(5, jax.random.PRNGKey(2))      # 42 rows now
    module2.remove_components(jnp.array([0, 3]))          # 40 rows now
    out2 = jax.block_until_ready(components_copy_pallas(module2._components))
    assert out2.shape == (module2.num_components, 128)
    assert bool(jnp.array_equal(out2, module2._components))

    print("KERNEL_OK")
</pallas_src>

<mosaic_0001>
module attributes {stable_mosaic.version = 11 : i64} {
  func.func @_components_copy_kernel(%arg0: memref<8x128xf32, #tpu.memory_space<any>>, %arg1: memref<8x128xf32, #tpu.memory_space<any>>, %arg2: memref<!tpu.dma_semaphore, #tpu.memory_space<semaphore_mem>>) attributes {dimension_semantics = [], scalar_prefetch = 0 : i64, scratch_operands = 1 : i64, tpu.core_type = #tpu.core_type<tc>} {
    tpu.enqueue_dma source(%arg0 : memref<8x128xf32, #tpu.memory_space<any>>) target(%arg1 : memref<8x128xf32, #tpu.memory_space<any>>) target_semaphore(%arg2 : memref<!tpu.dma_semaphore, #tpu.memory_space<semaphore_mem>>)
    tpu.wait_dma2 semaphore(%arg2 : memref<!tpu.dma_semaphore, #tpu.memory_space<semaphore_mem>>) src(%arg0 : memref<8x128xf32, #tpu.memory_space<any>>) dst(%arg1 : memref<8x128xf32, #tpu.memory_space<any>>)
    return
  }
}

</mosaic_0001>

<bundles_post_ra>
// kernel: tpu_custom_call.1
= control target key start
LH: loop header
LB: loop body
LE: loop exit
PB: predicated region body
PF: predicated region fallthrough
CT: control target
= control target key end

     0   :  { %s34_s6 = smov [#allocation2]   ;;  %s35_s7 = smov [#allocation3]   ;;  %s53_s0 = inlined_call_operand.hbm [shape: f32[8,128], index: 0, kind: input, shape index: {}]   ;;  %s54_s1 = inlined_call_operand.hbm [shape: f32[8,128], index: 1, kind: output, shape index: {}]  }
   0x1   :  { %s36_s8 = smov 0  }
   0x2   :  { %18 = dma.general %s53_s0, 128, %s54_s1, %s34_s6, %s35_s7, [#allocation4], %s36_s8, 0  }
   0x3   :  { %32 = dma.done.wait [#allocation2], 128 }
   0x4   :  { %33 = vsyncadd [#allocation2], 4294967168 }
   0x5   :  { %22 = vsyncmov [#allocation2] }
   0x8   :  { %s23_s13 = vpop.sfrf %22 }
   0x9   :  { %p28_p0 = scmp.ne.s32.totalorder %s23_s13, 0 }
   0xb   :  { %27 = shalt.err (%p28_p0)  }

</bundles_post_ra>
